<compile_context>
chip_gen: v7x
topology: tpu7x:2x2x1
jax: 0.10.0
libtpu: 0.0.40
codegen_flags: <defaults>
</compile_context>

<pallas_src>
import functools

import jax
import jax.numpy as jnp
from jax.experimental import pallas as pl
from jax.experimental.pallas import tpu as pltpu


def _round_up(x, m):
    return (x + m - 1) // m * m


def _patch_embed_kernel(x_ref, w_ref, b_ref, o_ref):
    # x_ref: (TM, K) patch tile, w_ref: (K, TN) weight tile, b_ref: (1, TN) f32
    # bias, o_ref: (TM, TN) output tile.  Single MXU dot with f32 accumulation
    # plus one f32 VPU epilogue (bias add + final cast).
    acc = jnp.dot(x_ref[...], w_ref[...], preferred_element_type=jnp.float32)
    o_ref[...] = (acc + b_ref[...]).astype(o_ref.dtype)


def _choose_tiles(M, N, K, in_bytes, out_bytes, vmem_tile_budget):
    """Pick (TM, TN, M_pad, N_pad) for the 2-D GEMM grid."""
    N_pad = _round_up(N, 128)          # lane-dense (unmasked) output stores
    n_lanes = N_pad // 128

    # Tall M tiles (fewer grid steps, bigger DMAs), capped at 1024, multiples
    # of 16 (bf16 sublane packing); for large M prefer a multiple of 128 that
    # divides M exactly so there is no row padding / post-kernel slice.
    TM_CAP = 1024
    if M <= TM_CAP:
        TM = _round_up(M, 16)
    else:
        TM = TM_CAP
        for cand in range(TM_CAP, 127, -128):
            if M % cand == 0:
                TM = cand
                break

    def footprint(tm, tn):
        # Double-buffered input / output tiles plus the (1, TN) f32 bias.
        return 2 * (tm * K * in_bytes + K * tn * in_bytes + tn * 4
                    + tm * tn * out_bytes)

    # Largest TN (multiple of 128) dividing N_pad that fits the VMEM budget —
    # a single N block whenever possible so the weight matrix is fetched once.
    TN = 128
    for d in range(n_lanes, 0, -1):
        if n_lanes % d == 0 and footprint(TM, d * 128) <= vmem_tile_budget:
            TN = d * 128
            break

    # If even (TM, 128) blows the budget (huge K), shrink TM instead.
    while footprint(TM, TN) > vmem_tile_budget and TM > 16:
        TM = max(16, _round_up(TM // 2, 16))

    M_pad = _round_up(M, TM)

    # v7x has 2 TensorCores: guarantee >= 2 "parallel" blocks when the whole
    # problem fits a single tile (neutral on single-TC v5e/v6e).
    if (M_pad // TM) * (N_pad // TN) < 2 and TM >= 32:
        TM = max(8, _round_up(TM // 2, 8))
        M_pad = _round_up(M, TM)

    return TM, TN, M_pad, N_pad


@functools.partial(
    jax.jit, static_argnames=("patch_size", "compute_dtype", "out_dtype"))
def patch_embed_forward(x, weight, bias, *, patch_size,
                        compute_dtype=jnp.bfloat16, out_dtype=jnp.bfloat16):
    """x: (B, C, H, W) NCHW.  weight: (E, C, P, P) Conv2d layout.  bias: (E,).

    Returns (B, num_patches, E) in `out_dtype`.  MXU operands are fed in
    `compute_dtype` (bf16 default; pass jnp.float32 for both dtypes if bitwise
    f32 parity with the PyTorch module is required, at ~2x bandwidth/MXU cost).
    """
    B, C, H, W = x.shape
    P = patch_size
    E = weight.shape[0]
    Hp, Wp = H // P, W // P
    num_patches = Hp * Wp

    K = C * P * P
    M = B * num_patches
    N = E

    in_bytes = jnp.dtype(compute_dtype).itemsize
    out_bytes = jnp.dtype(out_dtype).itemsize

    VMEM_TILE_BUDGET = 40 * 1024 * 1024   # double-buffered tiles; safe on v7x
    TM, TN, M_pad, N_pad = _choose_tiles(
        M, N, K, in_bytes, out_bytes, VMEM_TILE_BUDGET)

    # --- glue: cast first (halves transpose bytes), then patch-major layout +
    # row pad, all one producer chain that allow_input_fusion can fuse into the
    # kernel's input DMA (no extra HBM materialization when the fusion is taken).
    patches = x.astype(compute_dtype)
    patches = patches.reshape(B, C, Hp, P, Wp, P)
    patches = jnp.transpose(patches, (0, 2, 4, 1, 3, 5))
    patches = patches.reshape(M, K)
    if M_pad != M:
        patches = jnp.pad(patches, ((0, M_pad - M), (0, 0)))

    # Conv weight -> dense projection matrix (K, N_pad); bias -> (1, N_pad) f32.
    w_mat = weight.astype(compute_dtype).reshape(E, K).T
    if N_pad != N:
        w_mat = jnp.pad(w_mat, ((0, 0), (0, N_pad - N)))
    b_mat = jnp.pad(bias.astype(jnp.float32), (0, N_pad - N)).reshape(1, N_pad)

    grid = (M_pad // TM, N_pad // TN)

    tile_bytes = 2 * (TM * K * in_bytes + K * TN * in_bytes + TN * 4
                      + TM * TN * out_bytes)
    vmem_limit = min(56 * 1024 * 1024,
                     max(32 * 1024 * 1024, tile_bytes + 8 * 1024 * 1024))

    cost = pl.CostEstimate(
        flops=2 * M_pad * N_pad * K,
        transcendentals=0,
        bytes_accessed=(M_pad * K * in_bytes + K * N_pad * in_bytes
                        + N_pad * 4 + M_pad * N_pad * out_bytes),
    )

    out = pl.pallas_call(
        _patch_embed_kernel,
        out_shape=jax.ShapeDtypeStruct((M_pad, N_pad), out_dtype),
        grid=grid,
        in_specs=[
            # Patch tile: new block each M step.  If a profile shows exposed
            # input DMA, add pipeline_mode=pl.Buffered(3) here (cheap in VMEM).
            pl.BlockSpec((TM, K), lambda i, j: (i, 0)),
            # Weight / bias: constant along M; with a single N block they are
            # DMA'd exactly once and stay resident.
            pl.BlockSpec((K, TN), lambda i, j: (0, j)),
            pl.BlockSpec((1, TN), lambda i, j: (0, j)),
        ],
        out_specs=pl.BlockSpec((TM, TN), lambda i, j: (i, j)),
        compiler_params=pltpu.CompilerParams(
            dimension_semantics=("parallel", "parallel"),
            vmem_limit_bytes=vmem_limit,
            allow_input_fusion=[True, False, False],
        ),
        cost_estimate=cost,
    )(patches, w_mat, b_mat)

    if M_pad != M or N_pad != N:
        out = out[:M, :N]
    return out.reshape(B, num_patches, E)


if __name__ == "__main__":
    # Small shapes consistent with the module: img_size=16, patch_size=4,
    # in_chans=3, embed_dim=32, batch=2.
    img_size = 16
    patch_size = 4
    in_chans = 3
    embed_dim = 32
    B = 2

    key = jax.random.PRNGKey(0)
    kx, kw, kb = jax.random.split(key, 3)

    x = jax.random.normal(kx, (B, in_chans, img_size, img_size), dtype=jnp.float32)
    weight = 0.02 * jax.random.normal(
        kw, (embed_dim, in_chans, patch_size, patch_size), dtype=jnp.float32)
    bias = 0.01 * jax.random.normal(kb, (embed_dim,), dtype=jnp.float32)

    out = patch_embed_forward(x, weight, bias, patch_size=patch_size)
    out = jax.block_until_ready(out)

    num_patches = (img_size // patch_size) ** 2
    assert out.shape == (B, num_patches, embed_dim), out.shape
    assert out.dtype == jnp.bfloat16, out.dtype

    # Reference: plain f32 conv-as-matmul.  Kernel feeds bf16 operands to the
    # MXU (f32 accumulation) and stores bf16, so compare at bf16 tolerance.
    Hp = img_size // patch_size
    ref_patches = x.reshape(B, in_chans, Hp, patch_size, Hp, patch_size)
    ref_patches = jnp.transpose(ref_patches, (0, 2, 4, 1, 3, 5)).reshape(
        B * num_patches, in_chans * patch_size * patch_size)
    ref = (ref_patches @ weight.reshape(embed_dim, -1).T + bias).reshape(
        B, num_patches, embed_dim)
    out_f32 = out.astype(jnp.float32)
    err = float(jnp.max(jnp.abs(out_f32 - ref)))
    assert jnp.allclose(out_f32, ref, atol=1e-2, rtol=1e-2), err

    print("KERNEL_OK")
</pallas_src>

<mosaic_0001>
module attributes {stable_mosaic.version = 11 : i64} {
  func.func @_patch_embed_kernel(%arg0: i32, %arg1: i32, %arg2: memref<16x48xbf16, #tpu.memory_space<vmem>>, %arg3: memref<48x128xbf16, #tpu.memory_space<vmem>>, %arg4: memref<1x128xf32, #tpu.memory_space<vmem>>, %arg5: memref<16x128xbf16, #tpu.memory_space<vmem>>) attributes {dimension_semantics = [#tpu.dimension_semantics<parallel>, #tpu.dimension_semantics<parallel>], iteration_bounds = array<i64: 2, 1>, scalar_prefetch = 0 : i64, scratch_operands = 0 : i64, tpu.core_type = #tpu.core_type<tc>, window_params = [{transform_indices = @transform_0, window_bounds = array<i64: 16, 48>}, {transform_indices = @transform_1, window_bounds = array<i64: 48, 128>}, {transform_indices = @transform_2, window_bounds = array<i64: 1, 128>}, {transform_indices = @transform_3, window_bounds = array<i64: 16, 128>}]} {
    %c0 = arith.constant 0 : index
    %c0_0 = arith.constant 0 : index
    %0 = vector.load %arg2[%c0, %c0_0] : memref<16x48xbf16, #tpu.memory_space<vmem>>, vector<16x48xbf16>
    %c0_1 = arith.constant 0 : index
    %c0_2 = arith.constant 0 : index
    %1 = vector.load %arg3[%c0_1, %c0_2] : memref<48x128xbf16, #tpu.memory_space<vmem>>, vector<48x128xbf16>
    %cst = arith.constant dense<0.000000e+00> : vector<16x128xf32>
    %2 = tpu.matmul %0, %1, %cst {dimension_numbers = #tpu.dot_dimension_numbers<[1], [0], [0], [1], [0, 0, 1, 1], [], []>} : vector<16x48xbf16>, vector<48x128xbf16>, vector<16x128xf32> -> vector<16x128xf32>
    %c0_3 = arith.constant 0 : index
    %c0_4 = arith.constant 0 : index
    %3 = vector.load %arg4[%c0_3, %c0_4] : memref<1x128xf32, #tpu.memory_space<vmem>>, vector<1x128xf32>
    %4 = vector.broadcast %3 : vector<1x128xf32> to vector<16x128xf32>
    %5 = arith.addf %2, %4 : vector<16x128xf32>
    %6 = arith.truncf %5 : vector<16x128xf32> to vector<16x128xbf16>
    %c0_5 = arith.constant 0 : index
    %c0_6 = arith.constant 0 : index
    %7 = vector.load %arg5[%c0_5, %c0_6] : memref<16x128xbf16, #tpu.memory_space<vmem>>, vector<16x128xbf16>
    tpu.vector_store %arg5[%c0_5, %c0_6], %6 {strides = array<i32>} : memref<16x128xbf16, #tpu.memory_space<vmem>>, vector<16x128xbf16>,
    return
  }
  func.func @transform_0(%arg0: i32, %arg1: i32) -> (i32, i32) {
    %c0_i32 = arith.constant 0 : i32
    %c0_i32_0 = arith.constant 0 : i32
    return %arg0, %c0_i32 : i32, i32
  }
  func.func @transform_1(%arg0: i32, %arg1: i32) -> (i32, i32) {
    %c0_i32 = arith.constant 0 : i32
    %c0_i32_0 = arith.constant 0 : i32
    return %c0_i32, %arg1 : i32, i32
  }
  func.func @transform_2(%arg0: i32, %arg1: i32) -> (i32, i32) {
    %c0_i32 = arith.constant 0 : i32
    %c0_i32_0 = arith.constant 0 : i32
    return %c0_i32, %arg1 : i32, i32
  }
  func.func @transform_3(%arg0: i32, %arg1: i32) -> (i32, i32) {
    %c0_i32 = arith.constant 0 : i32
    return %arg0, %arg1 : i32, i32
  }
}

</mosaic_0001>

<bundles_post_ra>
// kernel: patch_embed_forward.1
= control target key start
LH: loop header
LB: loop body
LE: loop exit
PB: predicated region body
PF: predicated region fallthrough
CT: control target
= control target key end

     0   :  { %8 = vsyncpa [#allocation3], 0  ;;  %s764_s0 = inlined_call_operand.vmem [shape: bf16[32,48], index: 0, kind: input, shape index: {}]   ;;  %s765_s1 = inlined_call_operand.vmem [shape: bf16[48,128], index: 1, kind: input, shape index: {}]   ;;  %s766_s2 = inlined_call_operand.vmem [shape: f32[1,128], index: 2, kind: input, shape index: {}]   ;;  %s767_s3 = inlined_call_operand.hbm [shape: bf16[32,128], index: 3, kind: output, shape index: {}]  }
   0x1   :  { %10 = vsyncpa [#allocation3 + $0x1], 0  ;;  %s638_s12 = smov 0   ;;  %s640_s13 = smov 0  }
   0x2   :  { %s642_s14 = smov 0   ;;  %s644_s15 = smov 0  }
   0x3   :  { %s646_s16 = smov 0   ;;  %s648_s17 = smov 0  }
   0x4 LB: > { %s425_s18 = sadd.s32 4294967295, %s611_s17   ;;  %s426_s19 = sadd.s32 4294967294, %s611_s17   ;;  %s611_s17 = sphi %s648_s17, %s16_s17   ;;  %s607_s16 = sphi %s646_s16, %s774_s16   ;;  %s603_s15 = sphi %s644_s15, %s773_s15   ;;  %s599_s14 = sphi %s642_s14, %s772_s14   ;;  %s595_s13 = sphi %s640_s13, %s771_s13   ;;  %s591_s12 = sphi %s638_s12, %s770_s12  }
   0x5   : > { %s28_s20 = sadd.s32 1, %s607_s16  ;;  %s115_s21 = sadd.s32 1, %s599_s14 }
   0x6   : > { %p30_p0 = scmp.ge.s32.totalorder %s28_s20, 2  ;;  %p125_p1 = scmp.ne.s32.totalorder %s599_s14, %s595_s13 }
   0x7   : > { %p126_p2 = scmp.eq.s32.totalorder %s425_s18, 1  ;;  %p131_p3 = scmp.ne.s32.totalorder %s595_s13, %s591_s12 }
   0x8   : > { %s776_s20 = smov (%p30_p0, %s28_s20), 0  ;;  %p132_p5 = scmp.eq.s32.totalorder %s426_s19, 1 }
   0x9   : > { %p678_p4 = por %p126_p2, %p125_p1  ;;  %s110_s23 = ssub.s32 %s607_s16, %s776_s20 }
   0xa   : > { %p431_p6 = scmp.ge.s32.totalorder %s611_s17, 1  ;;  %p113_p7 = scmp.eq.s32.totalorder %s110_s23, 0 }
   0xb   : > { %p685_p8 = por %p132_p5, %p131_p3  ;;  %p172_p9 = scmp.lt.s32.totalorder %s611_s17, 3 }
   0xc   : > { %s691_s25 = scalar_select %p113_p7, %s599_s14, %s115_s21  }
   0xd   : > { %p173_p10 = pnand %p431_p6, %p172_p9 }
   0xe   : > { %v529_v0 = vld [vmem:[%s765_s1] sm:$0xff] (!%p173_p10)   ;;  %v613_v1 = vmov (!%p173_p10), 0.0   ;;  %v530_v2 = vld [vmem:[%s765_s1 + $0x8] sm:$0xff] (!%p173_p10)   ;;  %vm614_vm0 = vmmov (!%p173_p10), 0   ;;  %s433_s30 = sshll.u32 (!%p173_p10), %s603_s15, 1  ;;  %v531_v3 = vld [vmem:[%s765_s1 + $0x10] sm:$0xff] (!%p173_p10)  }
   0xf   : > { %176 = sbr.rel (%p173_p10) target bundleno = 260 (0x104), region = 32  ;;  %460 = vmatprep.subr.bf16.mxu0 (!%p173_p10), %v613_v1  ;;  %466 = vmatprep.mubr.msk.bf16.mxu0 (!%p173_p10), %vm614_vm0, %v613_v1  ;;  %p204_p11 = scmp.lt.s32.totalorder (!%p173_p10), %s433_s30, 3  ;;  %vm256_vm1 = vcmask (!%p173_p10), 392192   ;;  %v435_v5 = vld [vmem:[%s766_s2] ss:$0 sm:$0xff] (!%p173_p10) }
  0x10   : > { %461 = vmatpush3.bf16.msra.mxu0 (!%p173_p10), %v529_v0  ;;  %s200_s10 = sand.u32 (!%p173_p10), 1, %s595_s13   ;;  %s450_s26 = sshll.u32 (!%p173_p10), %s603_s15, 7 }
  0x11   : > { %462 = vmatprep.subr.bf16.mxu0 (!%p173_p10), %v613_v1  ;;  %s432_s11 = sshll.u32 (!%p173_p10), %s200_s10, 3  ;;  %s716_s29 = scalar_lea.hbm (!%p173_p10), %s767_s3, %s450_s26 }
  0x12   : > { %s202_s21 = scalar_lea.vmem (!%p173_p10), [#allocation2], %s432_s11  ;;  %s615_s15 = smov (!%p173_p10), [#allocation2]  }
  0x13   : > { %s326_s23 = sshll.u32 (!%p173_p10), %s202_s21, 4  ;;  %s537_s5 = sshll.u32 (!%p173_p10), %s615_s15, 4  ;;  %s711_s23 = int_to_ptr.vmem [resolvable:$true] %s326_s23  ;;  %s538_s5 = int_to_ptr.vmem [resolvable:$false] %s537_s5 }
  0x14   : > { %463 = vmatpush3.bf16.msra.mxu0 (!%p173_p10), %v530_v2  ;;  %s533_s4 = scalar_lea.vmem (!%p173_p10), %s711_s23, 128  ;;  %p540_p1 = scmp.lt.s32.totalorder (!%p173_p10), %s711_s23, %s538_s5 }
  0x15   : > { %464 = vmatprep.subr.bf16.mxu0 (!%p173_p10), %v613_v1  ;;  %p534_p12 = scmp.ne.s32.totalorder (!%p173_p10), %s711_s23, %s533_s4 }
  0x16   : > { %s778_s30 = smov (!%p204_p11, %s433_s30), 3 }
  0x17   : > { %s434_s6 = sshll.u32 %s778_s30, 2  ;;  %s718_s30 = scalar_lea.sflag [#allocation3], %s200_s10 }
  0x18   : > { %s207_s9 = scalar_lea.vmem %s764_s0, %s434_s6  ;;  %465 = vmatpush3.bf16.msra.mxu0 %v531_v3  ;;  %p535_p13 = pnand %p534_p12, %p678_p4 }
  0x19   : > { %v532_v4 = vld [vmem:[%s207_s9] sm:$0xff]   ;;  %s539_s6 = scalar_lea.vmem %s538_s5, 256 }
  0x1a   : > { %p536_p0 = pneg %p535_p13  ;;  %p541_p2 = scmp.lt.s32.totalorder %s539_s6, %s533_s4 }
  0x1b   : > { %467 = vmatmul.mubr.msk.bf16.vlgmr.msra.gmra.mrb[0].mxu0 %vm256_vm1, %v532_v4 }
  0x1c   : > { %p542_p3 = por %p541_p2, %p540_p1 }
  0x1e   : > { %p543_p5 = pnand %p542_p3, %p536_p0 }
  0xee   : > { %v294_v6 = vpop.f32.mrb[0].mxu0 }
  0xef   : > { %v468_v7 = vpop.f32.mrb[1].mxu0  ;;  %v295_v9 = vadd.f32 %v435_v5, %v294_v6 }
  0xf0   : > { %v297_v8 = vpop.f32.mrb[2].mxu0 }
  0xf1   : > { %v298_v10 = vadd.f32 %v435_v5, %v297_v8  ;;  %v469_v11 = vpop.f32.mrb[3].mxu0 }
  0xf3   : > { %v454_v12 = vpack.c.bf16 %v298_v10, %v295_v9 }
  0xf5   : > { %455 = vst [vmem:[%s202_s21] sm:$0xff] %v454_v12  }
  0xf6   : > { %546 = shalt.err (!%p543_p5)
}
  0xf7   : > { %s547_s7 = scalar_lea.hbm %s716_s29, 128  ;;  %s551_s10 = scalar_lea.hbm %s767_s3, 256 }
  0xf8   : > { %p548_p6 = scmp.ne.s32.totalorder %s716_s29, %s547_s7  ;;  %p552_p10 = scmp.lt.u32.totalorder %s716_s29, %s767_s3 }
  0xf9   : > { %p553_p11 = scmp.lt.u32.totalorder %s551_s10, %s547_s7  ;;  %p555_p13 = scmp.lt.u32.totalorder %s547_s7, %s716_s29 }
  0xfa   : > { %p549_p7 = pnand %p548_p6, %p678_p4 }
  0xfb   : > { %p554_p12 = por %p553_p11, %p552_p10 }
  0xfc   : > { %p550_p9 = pneg %p549_p7 }
  0xfd   : > { %p556_p0 = por %p555_p13, %p554_p12 }
  0xff   : > { %p557_p1 = pnand %p556_p0, %p550_p9 }
 0x101   : > { %560 = shalt.err (!%p557_p1)
}
 0x102   : > { %s616_s19 = smov 64   ;;  %s617_s21 = smov 4  }
 0x103   : > { %470 = dma.vmem_to_hbm [thread:$0]  (%p678_p4), %s711_s23, 128, %s716_s29, %s718_s30, %s616_s19, %s616_s19, %s617_s21  }
 0x104 PF: > { %p476_p2 = scmp.ge.s32.totalorder %s611_s17, 2  ;;  %s341_s26 = sand.u32 1, %s591_s12  }
 0x105   : > { %s342_s27 = scalar_lea.sflag [#allocation3], %s341_s26 }
 0x106   : > { %p473_p3 = pnand %p476_p2, %p685_p8 }
 0x108   : > { %586 = dma.done.wait (!%p473_p3), %s342_s27, 128  }
 0x109   : > { %588 = vsyncadd (!%p473_p3), %s342_s27, 4294967168  ;;  %s16_s17 = sadd.s32 1, %s611_s17   ;;  %s770_s12 = smov %s595_s13 }
 0x10a   : > { %p13_p5 = scmp.ge.s32.totalorder %s16_s17, 4   ;;  %s771_s13 = smov %s599_s14 }
 0x10b   : > { %s772_s14 = smov %s691_s25  ;;  %s773_s15 = smov %s607_s16 }
 0x10c   : > { %s774_s16 = smov %s776_s20  ;;  %15 = sbr.rel (!%p13_p5) target bundleno = 4 (0x4), region = 73 }
 0x113   :  { %347 = vsyncpa [#allocation3], 1 }
 0x114   :  { %349 = vsyncpa [#allocation3 + $0x1], 1 }

</bundles_post_ra>
